<compile_context>
chip_gen: v7x
topology: tpu7x:2x2x1
jax: 0.10.0
libtpu: 0.0.40
codegen_flags: <defaults>
</compile_context>

<pallas_src>
import functools

import jax
import jax.numpy as jnp
from jax import lax
from jax.experimental import pallas as pl
from jax.experimental.pallas import tpu as pltpu


_NEG_INF = jnp.float32(-1e30)   # finite key-padding mask (no NaN from exp)


def _self_attention_kernel(
    # scalar prefetch (SMEM)
    gamma_ref,        # (1,)  f32
    # VMEM inputs
    x_ref,            # (1, C, TQ)  query tile of x (also the residual), f32
    mx_ref,           # (1, C, N)   M @ x, compute dtype
    r_ref,            # (1, 1, N)   u @ x  (+ -inf mask on padded keys), f32
    vt_ref,           # (1, N, C)   (Wv @ x + bv)^T, compute dtype
    # output
    o_ref,            # (1, C, TQ)
    *, compute_dtype):
    xq = x_ref[0]                                              # (C, TQ) f32

    # energy[i, j] = x_i^T M x_j + u . x_j   -> (TQ, N), f32 accumulation.
    # Contraction over C of both operands: only the small (C, TQ) LHS gets
    # relayouted; the big (C, N) operand is consumed in place.
    energy = lax.dot_general(
        xq.astype(compute_dtype), mx_ref[0],
        dimension_numbers=(((0,), (0,)), ((), ())),
        preferred_element_type=jnp.float32)
    energy = energy + r_ref[0]                                 # (1, N) bcast

    # Softmax over keys, kept UNNORMALIZED: normalization (and gamma) are
    # folded past the second matmul into a (TQ, 1) scale on the small result.
    emax = jnp.max(energy, axis=-1, keepdims=True)
    p = jnp.exp(energy - emax)                                 # (TQ, N) f32
    l = jnp.sum(p, axis=-1, keepdims=True)                     # (TQ, 1)

    # out_t[i, c] = sum_j p[i, j] * v_t[j, c]  -> (TQ, C).
    # Canonical contraction (last dim of LHS, first of RHS): no transpose of
    # the big (TQ, N) tile; only the tiny (TQ, C) result is transposed below.
    out_t = lax.dot_general(
        p.astype(compute_dtype), vt_ref[0],
        dimension_numbers=(((1,), (0,)), ((), ())),
        preferred_element_type=jnp.float32)

    scale = gamma_ref[0] * pl.reciprocal(l, approx=False)      # (TQ, 1)
    out_t = out_t * scale                                      # C*TQ muls only

    # Lane-dense (C, TQ) store: small transpose + residual add.
    o_ref[0] = (jnp.transpose(out_t) + xq).astype(o_ref.dtype)


def _vmem_capacity_bytes():
    """Physical VMEM of the current chip; conservative fallback if unknown."""
    try:
        info = pltpu.get_tpu_info()
        cap = getattr(info, "vmem_capacity_bytes", None)
        if cap:
            return int(cap)
    except Exception:
        pass
    return 64 * 1024 * 1024          # v7x-sized fallback, safe everywhere


def _resident_bytes(c, n_pad, tq, cbytes):
    """VMEM bytes resident during one grid step (double-buffered blocks plus
    the energy / p / cast-p temporaries)."""
    return (
        2 * c * tq * 4               # x blocks
        + 2 * c * tq * 4             # out blocks
        + 2 * c * n_pad * cbytes     # M@x blocks
        + 2 * n_pad * c * cbytes     # V^T blocks
        + 2 * n_pad * 4              # u@x blocks
        + 2 * tq * n_pad * 4         # energy, p (f32)
        + tq * n_pad * cbytes        # p cast for the MXU
        + 4 * tq * c * 4             # out_t + small temporaries
    )


def _pick_query_tile(n_pad, c, cbytes, vmem_cap):
    """Largest 128-multiple query tile whose per-step footprint stays inside a
    generation-aware budget (~35% of physical VMEM): 512 on 128 MiB v5e/v6e at
    moderate N, 256 or smaller on 64 MiB v7x / very large N."""
    budget = int(0.35 * vmem_cap)
    candidates = [t for t in (512, 384, 256, 128) if n_pad % t == 0]
    if not candidates:
        candidates = [n_pad]
    for t in candidates:
        if _resident_bytes(c, n_pad, t, cbytes) <= budget:
            return t
    return candidates[-1]


def self_attention_pallas(x_nchw, wq, bq, wk, bk, wv, bv, gamma, *,
                          matmul_dtype=jnp.bfloat16, tq=None):
    """Forward pass of Self_Attention.

    x_nchw : (B, C, W, H) float32
    wq, wk : (C//16, C) 1x1-conv weights,  bq, bk: (C//16,)
    wv     : (C, C),                       bv: (C,)
    gamma  : (1,)
    matmul_dtype : dtype of MXU operands (bf16 = native MXU throughput);
        accumulation, softmax, scaling and residual stay f32.
    """
    B, C, W, H = x_nchw.shape
    N = W * H
    n_pad = ((N + 127) // 128) * 128
    x_flat = x_nchw.reshape(B, C, N)                 # free reshape of NCHW
    if n_pad != N:
        x_flat = jnp.pad(x_flat, ((0, 0), (0, 0), (0, n_pad - N)))

    hp = lax.Precision.HIGHEST

    # Fold the q/k 1x1 convs (terms constant over the key index cancel in the
    # softmax): M = Wq^T Wk, u = bq^T Wk.
    m = jnp.dot(wq.T, wk, precision=hp).astype(jnp.float32)       # (C, C)
    u = jnp.dot(bq, wk, precision=hp).astype(jnp.float32)         # (C,)

    # K/V-side precompute hoisted out of the kernel (O(C*N) per batch).
    mx = jnp.einsum('cd,bdn->bcn', m, x_flat,
                    precision=hp).astype(matmul_dtype)            # (B, C, Np)
    r = jnp.einsum('d,bdn->bn', u, x_flat,
                   precision=hp)[:, None, :].astype(jnp.float32)  # (B, 1, Np)
    if n_pad != N:
        r = r.at[:, :, N:].set(_NEG_INF)       # zero softmax weight on padding
    vt = (jnp.einsum('cd,bdn->bnc', wv, x_flat, precision=hp)
          + bv[None, None, :]).astype(matmul_dtype)               # (B, Np, C)

    gamma_s = gamma.reshape(1).astype(jnp.float32)                # -> SMEM

    cbytes = jnp.dtype(matmul_dtype).itemsize
    vmem_cap = _vmem_capacity_bytes()
    if tq is None:
        tq = _pick_query_tile(n_pad, C, cbytes, vmem_cap)
    assert n_pad % tq == 0 and tq % 128 == 0
    n_q = n_pad // tq

    resident = _resident_bytes(C, n_pad, tq, cbytes)
    vmem_limit = int(min(max(1.35 * resident, 32 * 1024 * 1024),
                         0.80 * vmem_cap))
    vmem_limit = max(vmem_limit, int(1.2 * resident))   # never starve the kernel

    kernel = functools.partial(_self_attention_kernel,
                               compute_dtype=matmul_dtype)

    out_flat = pl.pallas_call(
        kernel,
        out_shape=jax.ShapeDtypeStruct((B, C, n_pad), x_flat.dtype),
        grid_spec=pltpu.PrefetchScalarGridSpec(
            num_scalar_prefetch=1,             # gamma -> SMEM scalar
            grid=(B, n_q),
            in_specs=[
                pl.BlockSpec((1, C, tq),    lambda b, q, g: (b, 0, q)),  # x
                pl.BlockSpec((1, C, n_pad), lambda b, q, g: (b, 0, 0)),  # M@x
                pl.BlockSpec((1, 1, n_pad), lambda b, q, g: (b, 0, 0)),  # u@x
                pl.BlockSpec((1, n_pad, C), lambda b, q, g: (b, 0, 0)),  # V^T
            ],
            out_specs=pl.BlockSpec((1, C, tq), lambda b, q, g: (b, 0, q)),
        ),
        compiler_params=pltpu.CompilerParams(
            # No cross-iteration state: both axes shard across TensorCores.
            dimension_semantics=("parallel", "parallel"),
            vmem_limit_bytes=vmem_limit,
        ),
    )(gamma_s, x_flat, mx, r, vt)

    if n_pad != N:
        out_flat = out_flat[:, :, :N]
    return out_flat.reshape(B, C, W, H)              # free reshape back to NCHW


def self_attention_ref(x_nchw, wq, bq, wk, bk, wv, bv, gamma):
    """Pure-JAX reference mirroring the PyTorch forward exactly (f32)."""
    hp = lax.Precision.HIGHEST
    B, C, W, H = x_nchw.shape
    N = W * H
    x_flat = x_nchw.reshape(B, C, N)                                    # (B, C, N)
    q = jnp.einsum('oc,bcn->bon', wq, x_flat, precision=hp) + bq[None, :, None]
    k = jnp.einsum('oc,bcn->bon', wk, x_flat, precision=hp) + bk[None, :, None]
    v = jnp.einsum('oc,bcn->bon', wv, x_flat, precision=hp) + bv[None, :, None]
    q = jnp.transpose(q, (0, 2, 1))                                     # (B, N, Cq)
    energy = jnp.einsum('bic,bcj->bij', q, k, precision=hp)             # (B, N, N)
    attention = jax.nn.softmax(energy, axis=-1)
    attention = jnp.transpose(attention, (0, 2, 1))                     # (B, N, N)
    out = jnp.einsum('bcj,bji->bci', v, attention, precision=hp)        # (B, C, N)
    out = out.reshape(B, C, W, H)
    return gamma[0] * out + x_nchw


if __name__ == "__main__":
    B, C, W, H = 2, 32, 16, 16          # N = 256 spatial tokens, Cq = C//16 = 2
    Cq = C // 16

    key = jax.random.PRNGKey(0)
    kx, kq, kk, kv, kbq, kbk, kbv = jax.random.split(key, 7)

    x = jax.random.normal(kx, (B, C, W, H), dtype=jnp.float32)
    wq = 0.1 * jax.random.normal(kq, (Cq, C), dtype=jnp.float32)
    wk = 0.1 * jax.random.normal(kk, (Cq, C), dtype=jnp.float32)
    wv = 0.1 * jax.random.normal(kv, (C, C), dtype=jnp.float32)
    bq = 0.05 * jax.random.normal(kbq, (Cq,), dtype=jnp.float32)
    bk = 0.05 * jax.random.normal(kbk, (Cq,), dtype=jnp.float32)
    bv = 0.05 * jax.random.normal(kbv, (C,), dtype=jnp.float32)
    # PyTorch init sets gamma = 0 (output == x); use a nonzero value so the
    # attention path is actually exercised.
    gamma = jnp.array([0.5], dtype=jnp.float32)

    ref = self_attention_ref(x, wq, bq, wk, bk, wv, bv, gamma)

    # 1) f32 MXU path, forced tq=128 (two query tiles). Tight check.
    out_f32 = self_attention_pallas(x, wq, bq, wk, bk, wv, bv, gamma,
                                    matmul_dtype=jnp.float32, tq=128)
    out_f32 = jax.block_until_ready(out_f32)
    assert out_f32.shape == (B, C, W, H)
    assert jnp.allclose(out_f32, ref, atol=1e-4, rtol=1e-4)

    # 2) Default path: bf16 MXU operands / f32 accumulation, auto query tile.
    out_bf16 = jax.block_until_ready(
        self_attention_pallas(x, wq, bq, wk, bk, wv, bv, gamma))
    assert out_bf16.shape == (B, C, W, H)
    assert jnp.allclose(out_bf16, ref, atol=2e-2, rtol=2e-2)

    # 3) Non-lane-aligned spatial size (N = 35 -> padded to 128): exercises the
    #    key-padding mask and the equal-to-full-dim block rule at small C.
    B2, C2, W2, H2 = 2, 16, 5, 7
    Cq2 = C2 // 16
    k2 = jax.random.split(jax.random.PRNGKey(1), 7)
    x2 = jax.random.normal(k2[0], (B2, C2, W2, H2), dtype=jnp.float32)
    wq2 = 0.1 * jax.random.normal(k2[1], (Cq2, C2), dtype=jnp.float32)
    wk2 = 0.1 * jax.random.normal(k2[2], (Cq2, C2), dtype=jnp.float32)
    wv2 = 0.1 * jax.random.normal(k2[3], (C2, C2), dtype=jnp.float32)
    bq2 = 0.05 * jax.random.normal(k2[4], (Cq2,), dtype=jnp.float32)
    bk2 = 0.05 * jax.random.normal(k2[5], (Cq2,), dtype=jnp.float32)
    bv2 = 0.05 * jax.random.normal(k2[6], (C2,), dtype=jnp.float32)
    gamma2 = jnp.array([0.7], dtype=jnp.float32)
    ref2 = self_attention_ref(x2, wq2, bq2, wk2, bk2, wv2, bv2, gamma2)
    out2 = jax.block_until_ready(
        self_attention_pallas(x2, wq2, bq2, wk2, bk2, wv2, bv2, gamma2,
                              matmul_dtype=jnp.float32))
    assert out2.shape == (B2, C2, W2, H2)
    assert jnp.allclose(out2, ref2, atol=1e-4, rtol=1e-4)

    print("KERNEL_OK")
</pallas_src>

<mosaic_0001>
module attributes {stable_mosaic.version = 11 : i64} {
  func.func @_self_attention_kernel(%arg0: i32, %arg1: i32, %arg2: memref<1xf32, #tpu.memory_space<smem>>, %arg3: memref<1x32x128xf32, #tpu.memory_space<vmem>>, %arg4: memref<1x32x256xf32, #tpu.memory_space<vmem>>, %arg5: memref<1x1x256xf32, #tpu.memory_space<vmem>>, %arg6: memref<1x256x32xf32, #tpu.memory_space<vmem>>, %arg7: memref<1x32x128xf32, #tpu.memory_space<vmem>>) attributes {dimension_semantics = [#tpu.dimension_semantics<parallel>, #tpu.dimension_semantics<parallel>], iteration_bounds = array<i64: 2, 2>, scalar_prefetch = 1 : i64, scratch_operands = 0 : i64, tpu.core_type = #tpu.core_type<tc>, window_params = [{transform_indices = @transform_0, window_bounds = array<i64: 1, 32, 128>}, {transform_indices = @transform_1, window_bounds = array<i64: 1, 32, 256>}, {transform_indices = @transform_2, window_bounds = array<i64: 1, 1, 256>}, {transform_indices = @transform_3, window_bounds = array<i64: 1, 256, 32>}, {transform_indices = @transform_4, window_bounds = array<i64: 1, 32, 128>}]} {
    %c0 = arith.constant 0 : index
    %c0_0 = arith.constant 0 : index
    %c0_1 = arith.constant 0 : index
    %0 = vector.load %arg3[%c0, %c0_0, %c0_1] : memref<1x32x128xf32, #tpu.memory_space<vmem>>, vector<1x32x128xf32>
    %1 = vector.shape_cast %0 : vector<1x32x128xf32> to vector<32x128xf32>
    %c0_2 = arith.constant 0 : index
    %c0_3 = arith.constant 0 : index
    %c0_4 = arith.constant 0 : index
    %2 = vector.load %arg4[%c0_2, %c0_3, %c0_4] : memref<1x32x256xf32, #tpu.memory_space<vmem>>, vector<1x32x256xf32>
    %3 = vector.shape_cast %2 : vector<1x32x256xf32> to vector<32x256xf32>
    %cst = arith.constant dense<0.000000e+00> : vector<128x256xf32>
    %4 = tpu.matmul %1, %3, %cst {dimension_numbers = #tpu.dot_dimension_numbers<[0], [0], [1], [1], [0, 1, 1, 1], [], []>} : vector<32x128xf32>, vector<32x256xf32>, vector<128x256xf32> -> vector<128x256xf32>
    %c0_5 = arith.constant 0 : index
    %c0_6 = arith.constant 0 : index
    %c0_7 = arith.constant 0 : index
    %5 = vector.load %arg5[%c0_5, %c0_6, %c0_7] : memref<1x1x256xf32, #tpu.memory_space<vmem>>, vector<1x1x256xf32>
    %6 = vector.shape_cast %5 : vector<1x1x256xf32> to vector<1x256xf32>
    %7 = vector.broadcast %6 : vector<1x256xf32> to vector<128x256xf32>
    %8 = arith.addf %4, %7 : vector<128x256xf32>
    %cst_8 = arith.constant dense<0xFF800000> : vector<128xf32>
    %9 = vector.multi_reduction <maximumf>, %8, %cst_8 [1] : vector<128x256xf32> to vector<128xf32>
    %10 = vector.shape_cast %9 : vector<128xf32> to vector<128x1xf32>
    %11 = vector.broadcast %10 : vector<128x1xf32> to vector<128x256xf32>
    %12 = arith.subf %8, %11 : vector<128x256xf32>
    %13 = math.exp %12 : vector<128x256xf32>
    %cst_9 = arith.constant dense<0.000000e+00> : vector<128xf32>
    %14 = vector.multi_reduction <add>, %13, %cst_9 [1] : vector<128x256xf32> to vector<128xf32>
    %15 = vector.shape_cast %14 : vector<128xf32> to vector<128x1xf32>
    %c0_10 = arith.constant 0 : index
    %c0_11 = arith.constant 0 : index
    %c0_12 = arith.constant 0 : index
    %16 = vector.load %arg6[%c0_10, %c0_11, %c0_12] : memref<1x256x32xf32, #tpu.memory_space<vmem>>, vector<1x256x32xf32>
    %17 = vector.shape_cast %16 : vector<1x256x32xf32> to vector<256x32xf32>
    %cst_13 = arith.constant dense<0.000000e+00> : vector<128x32xf32>
    %18 = tpu.matmul %13, %17, %cst_13 {dimension_numbers = #tpu.dot_dimension_numbers<[1], [0], [0], [1], [0, 0, 1, 1], [], []>} : vector<128x256xf32>, vector<256x32xf32>, vector<128x32xf32> -> vector<128x32xf32>
    %c0_14 = arith.constant 0 : index
    %19 = memref.load %arg2[%c0_14] : memref<1xf32, #tpu.memory_space<smem>>
    %20 = tpu.reciprocal %15 : vector<128x1xf32> -> vector<128x1xf32>
    %21 = vector.broadcast %19 : f32 to vector<128x1xf32>
    %22 = arith.mulf %21, %20 : vector<128x1xf32>
    %23 = vector.broadcast %22 : vector<128x1xf32> to vector<128x32xf32>
    %24 = arith.mulf %18, %23 : vector<128x32xf32>
    %25 = tpu.transpose %24, [1, 0] : vector<128x32xf32> -> vector<32x128xf32>
    %26 = arith.addf %25, %1 : vector<32x128xf32>
    %c0_15 = arith.constant 0 : index
    %c0_16 = arith.constant 0 : index
    %c0_17 = arith.constant 0 : index
    %27 = vector.load %arg7[%c0_15, %c0_16, %c0_17] : memref<1x32x128xf32, #tpu.memory_space<vmem>>, vector<1x32x128xf32>
    %28 = vector.shape_cast %27 : vector<1x32x128xf32> to vector<32x128xf32>
    %29 = vector.shape_cast %26 : vector<32x128xf32> to vector<1x32x128xf32>
    tpu.vector_store %arg7[%c0_15, %c0_16, %c0_17], %29 {strides = array<i32>} : memref<1x32x128xf32, #tpu.memory_space<vmem>>, vector<1x32x128xf32>,
    return
  }
  func.func @transform_0(%arg0: i32, %arg1: i32, %arg2: memref<1xf32, #tpu.memory_space<smem>>) -> (i32, i32, i32) {
    %c0_i32 = arith.constant 0 : i32
    %c0_i32_0 = arith.constant 0 : i32
    return %arg0, %c0_i32, %arg1 : i32, i32, i32
  }
  func.func @transform_1(%arg0: i32, %arg1: i32, %arg2: memref<1xf32, #tpu.memory_space<smem>>) -> (i32, i32, i32) {
    %c0_i32 = arith.constant 0 : i32
    %c0_i32_0 = arith.constant 0 : i32
    %c0_i32_1 = arith.constant 0 : i32
    return %arg0, %c0_i32, %c0_i32_0 : i32, i32, i32
  }
  func.func @transform_2(%arg0: i32, %arg1: i32, %arg2: memref<1xf32, #tpu.memory_space<smem>>) -> (i32, i32, i32) {
    %c0_i32 = arith.constant 0 : i32
    %c0_i32_0 = arith.constant 0 : i32
    %c0_i32_1 = arith.constant 0 : i32
    return %arg0, %c0_i32, %c0_i32_0 : i32, i32, i32
  }
  func.func @transform_3(%arg0: i32, %arg1: i32, %arg2: memref<1xf32, #tpu.memory_space<smem>>) -> (i32, i32, i32) {
    %c0_i32 = arith.constant 0 : i32
    %c0_i32_0 = arith.constant 0 : i32
    %c0_i32_1 = arith.constant 0 : i32
    return %arg0, %c0_i32, %c0_i32_0 : i32, i32, i32
  }
  func.func @transform_4(%arg0: i32, %arg1: i32, %arg2: memref<1xf32, #tpu.memory_space<smem>>) -> (i32, i32, i32) {
    %c0_i32 = arith.constant 0 : i32
    %c0_i32_0 = arith.constant 0 : i32
    return %arg0, %c0_i32, %arg1 : i32, i32, i32
  }
}

</mosaic_0001>

<bundles_post_ra>
// kernel: tpu_custom_call.1
= control target key start
LH: loop header
LB: loop body
LE: loop exit
PB: predicated region body
PF: predicated region fallthrough
CT: control target
= control target key end

     0   :  { %s2090_s0 = inlined_call_operand.<no memory space> [shape: f32[1], index: 0, kind: input, shape index: {}]   ;;  %s2091_s1 = inlined_call_operand.vmem [shape: f32[2,32,256], index: 1, kind: input, shape index: {}]   ;;  %s2092_s2 = inlined_call_operand.vmem [shape: f32[2,32,256], index: 2, kind: input, shape index: {}]   ;;  %s2093_s3 = inlined_call_operand.vmem [shape: f32[2,1,256], index: 3, kind: input, shape index: {}]   ;;  %s2094_s4 = inlined_call_operand.vmem [shape: f32[2,256,32], index: 4, kind: input, shape index: {}]   ;;  %s2095_s5 = inlined_call_operand.hbm [shape: f32[2,32,256], index: 5, kind: output, shape index: {}]  }
   0x1   :  { %10 = sst [smem:[#allocation3]] %s2090_s0 }
   0x2   :  { %11 = vsyncpa [#allocation6], 0 }
   0x3   :  { %13 = vsyncpa [#allocation6 + $0x1], 0  ;;  %s1661_s20 = smov 0   ;;  %s1663_s21 = smov 0  }
   0x4   :  { %s1665_s22 = smov 0   ;;  %s1667_s23 = smov 0  }
   0x5   :  { %s1669_s24 = smov 0   ;;  %s1671_s25 = smov 0  }
   0x6   :  { %s1673_s26 = smov 0   ;;  %s1675_s27 = smov 0  }
   0x7 LB: > { %s1178_s0 = sadd.s32 4294967295, %s1621_s27   ;;  %s1179_s28 = sadd.s32 4294967294, %s1621_s27   ;;  %s1621_s27 = sphi %s1675_s27, %s19_s27   ;;  %s1617_s26 = sphi %s1673_s26, %s2105_s26   ;;  %s1613_s25 = sphi %s1671_s25, %s2104_s25   ;;  %s1609_s24 = sphi %s1669_s24, %s2103_s24   ;;  %s1605_s23 = sphi %s1667_s23, %s2102_s23   ;;  %s1601_s22 = sphi %s1665_s22, %s2101_s22   ;;  %s1597_s21 = sphi %s1663_s21, %s2100_s21   ;;  %s1593_s20 = sphi %s1661_s20, %s2099_s20  }
   0x8   : > { %s28_s29 = sadd.s32 1, %s1613_s25  ;;  %s31_s30 = sadd.s32 1, %s1617_s26 }
   0x9   : > { %p29_p0 = scmp.ge.s32.totalorder %s28_s29, 2  ;;  %p47_p1 = scmp.ne.s32.totalorder %s1601_s22, %s1597_s21 }
   0xa   : > { %p48_p2 = scmp.eq.s32.totalorder %s1621_s27, 0  ;;  %p157_p5 = scmp.eq.s32.totalorder %s1178_s0, 3 }
   0xb   : > { %s2107_s29 = smov (%p29_p0, %s28_s29), 0  ;;  %s2109_s30 = smov (!%p29_p0, %s31_s30), %s1617_s26 }
   0xc   : > { %s36_s6 = ssub.s32 %s1613_s25, %s2107_s29  ;;  %p1713_p3 = por %p48_p2, %p47_p1 }
   0xd   : > { %p33_p4 = scmp.ge.s32.totalorder %s2109_s30, 2  ;;  %p162_p6 = scmp.ne.s32.totalorder %s1597_s21, %s1593_s20 }
   0xe   : > { %p163_p7 = scmp.eq.s32.totalorder %s1179_s28, 3  ;;  %p1721_p8 = por %p157_p5, %p47_p1 }
   0xf   : > { %s2111_s30 = smov (%p33_p4, %s2109_s30), 0  ;;  %s40_s12 = sadd.s32 1, %s1601_s22 }
  0x10   : > { %p1725_p9 = por %p163_p7, %p162_p6  ;;  %s35_s10 = ssub.s32 %s1617_s26, %s2111_s30 }
  0x11   : > { %s37_s11 = sor.u32 %s36_s6, %s35_s10  ;;  %p1181_p11 = scmp.ge.s32.totalorder %s1621_s27, 4 }
  0x12   : > { %p38_p10 = scmp.eq.s32.totalorder %s37_s11, 0 }
  0x13   : > { %179 = sbr.rel (%p1181_p11) target bundleno = 34 (0x22), region = 16 }
  0x14   : > { %s1733_s13 = scalar_select %p38_p10, %s1601_s22, %s40_s12  }
  0x1a   : > { %182 = sbr.rel (!%p1713_p3) target bundleno = 34 (0x22), region = 20  ;;  %s184_s14 = sand.u32 (%p1713_p3), 1, %s1601_s22  }
  0x1b   : > { %s1183_s15 = sshll.u32 (%p1713_p3), %s1617_s26, 3  ;;  %s1182_s16 = sshll.u32 (%p1713_p3), %s184_s14, 5 }
  0x1c   : > { %s188_s17 = sadd.s32 (%p1713_p3), %s1613_s25, %s1183_s15  ;;  %s186_s6 = scalar_lea.vmem (%p1713_p3), [#allocation4], %s1182_s16 }
  0x1d   : > { %s1184_s18 = sshll.u32 (%p1713_p3), %s188_s17, 3 }
  0x1e   : > { %s190_s28 = scalar_lea.vmem (%p1713_p3), %s2091_s1, %s1184_s18 }
  0x1f   : > { %v224_v0 = vld [vmem:[%s190_s28] sm:$0xff] (%p1713_p3)  ;;  %v226_v1 = vld [vmem:[%s190_s28 + $0x10] sm:$0xff] (%p1713_p3) }
  0x20   : > { %v228_v2 = vld [vmem:[%s190_s28 + $0x20] sm:$0xff] (%p1713_p3)  ;;  %225 = vst [vmem:[%s186_s6] sm:$0xff] (%p1713_p3), %v224_v0  ;;  %227 = vst [vmem:[%s186_s6 + $0x8] sm:$0xff] (%p1713_p3), %v226_v1  ;;  %v230_v3 = vld [vmem:[%s190_s28 + $0x30] sm:$0xff] (%p1713_p3) }
  0x21   : > { %229 = vst [vmem:[%s186_s6 + $0x10] sm:$0xff] %v228_v2  ;;  %231 = vst [vmem:[%s186_s6 + $0x18] sm:$0xff] %v230_v3 }
  0x22 PF: > { %p1185_p12 = scmp.ge.s32.totalorder %s1621_s27, 1  ;;  %p259_p13 = scmp.lt.s32.totalorder %s1621_s27, 5 }
  0x24   : > { %p260_p0 = pnand %p1185_p12, %p259_p13 }
  0x25   : > { %s266_s7 = sand.u32 (!%p260_p0), 1, %s1597_s21   ;;  %p305_p1 = scmp.lt.s32.totalorder (!%p260_p0), %s1609_s24, 1  ;;  %v1623_v4 = vmov (!%p260_p0), 0.0   ;;  %vm375_vm0 = vcmask (!%p260_p0), 261120  }
  0x26   : > { %263 = sbr.rel (%p260_p0) target bundleno = 922 (0x39a), region = 70  ;;  %s1749_s10 = sshll.u32 (!%p260_p0), %s266_s7, 5  ;;  %488 = vmatprep.mubr.f32.mxu0 (!%p260_p0), %v1623_v4 }
  0x27   : > { %s1754_s11 = scalar_lea.vmem (!%p260_p0), [#allocation4], %s1749_s10  ;;  %s1624_s15 = smov (!%p260_p0), [#allocation5]  }
  0x28   : > { %v319_v5 = vld [vmem:[%s1754_s11] sm:$0xff] (!%p260_p0)  ;;  %v320_v6 = vld [vmem:[%s1754_s11 + $0x8] sm:$0xff] (!%p260_p0)  ;;  %v321_v7 = vld [vmem:[%s1754_s11 + $0x10] sm:$0xff] (!%p260_p0) }
  0x29   : > { %343 = vxpose.xlu0.b32.start [1/4] (short) (!%p260_p0), %v319_v5, 128  ;;  %v322_v19 = vld [vmem:[%s1754_s11 + $0x18] sm:$0xff] (!%p260_p0) }
  0x2d   : > { %s1759_s12 = scalar_select %p305_p1, %s1609_s24, 1  ;;  %344 = vxpose.xlu0.b32.cont [2/4] (short) %v320_v6, 128 }
  0x2f   : > { %s1214_s14 = sshll.u32 %s1759_s12, 6  ;;  %s1215_s18 = sshll.u32 %s1759_s12, 8 }
  0x30   : > { %s309_s17 = scalar_lea.vmem %s2092_s2, %s1214_s14  ;;  %s1802_s28 = scalar_lea.vmem %s2094_s4, %s1215_s18 }
  0x31   : > { %v324_v8 = vld [vmem:[%s309_s17 + $0x8] sm:$0xff]  ;;  %v326_v9 = vld [vmem:[%s309_s17 + $0x18] sm:$0xff]  ;;  %v323_v11 = vld [vmem:[%s309_s17] sm:$0xff]  ;;  %345 = vxpose.xlu0.b32.cont [3/4] (short) %v321_v7, 128  ;;  %s1190_s6 = sshll.u32 %s1759_s12, 1  ;;  %s954_s12 = sld [smem:[#allocation3]] }
  0x32   : > { %v1296_v10 = vpack.c.bf16 %v326_v9, %v324_v8  ;;  %v325_v12 = vld [vmem:[%s309_s17 + $0x10] sm:$0xff]  ;;  %v328_v13 = vld [vmem:[%s309_s17 + $0x28] sm:$0xff]  ;;  %v330_v15 = vld [vmem:[%s309_s17 + $0x38] sm:$0xff]  ;;  %s313_s16 = scalar_lea.vmem %s2093_s3, %s1190_s6  ;;  %s1210_s18 = sshll.u32 %s1609_s24, 3 }
  0x33   : > { %v1298_v14 = vpack.c.bf16 %v325_v12, %v323_v11  ;;  %v327_v16 = vld [vmem:[%s309_s17 + $0x20] sm:$0xff]  ;;  %v329_v17 = vld [vmem:[%s309_s17 + $0x30] sm:$0xff]  ;;  %v1300_v18 = vpack.c.bf16 %v330_v15, %v328_v13  ;;  %v794_v38 = vld [vmem:[%s1802_s28 + $0x88] sm:$0xff]  ;;  %v333_v12 = vlaneseq  ;;  %s304_s17 = scalar_lea.vmem [#allocation5], %s1749_s10  ;;  %s1056_s19 = sadd.s32 %s1605_s23, %s1210_s18 }
  0x34   : > { %1297 = vmatprep.subr.bf16.mxu0 %v1296_v10  ;;  %v1302_v20 = vpack.c.bf16 %v329_v17, %v327_v16  ;;  %v793_v37 = vld [vmem:[%s1802_s28 + $0x80] sm:$0xff]  ;;  %v778_v41 = vld [vmem:[%s1802_s28 + $0x8] sm:$0xff]  ;;  %v795_v42 = vld [vmem:[%s1802_s28 + $0x90] sm:$0xff]  ;;  %s1059_s0 = sshll.u32 %s304_s17, 4  ;;  %s2038_s23 = scalar_lea.sflag [#allocation6], %s266_s7  ;;  %s2028_s0 = int_to_ptr.vmem [resolvable:$true] %s1059_s0 }
  0x35   : > { %1299 = vmatpush1.bf16.msra.mxu0 %v1298_v14  ;;  %346 = vxpose.xlu0.b32.end [4/4] (short) %v322_v19, 128  ;;  %v777_v39 = vld [vmem:[%s1802_s28] sm:$0xff]  ;;  %v1304_v40 = vpack.c.bf16 %v794_v38, %v793_v37  ;;  %v796_v43 = vld [vmem:[%s1802_s28 + $0x98] sm:$0xff]  ;;  %v779_v46 = vld [vmem:[%s1802_s28 + $0x10] sm:$0xff]  ;;  %v334_v13 = vshrl.u32 %v333_v12, 7  ;;  %s1527_s14 = scalar_lea.vmem %s2028_s0, 512 }
  0x36   : > { %1301 = vmatprep.subr.bf16.mxu0 %v1300_v18  ;;  %v1306_v44 = vpack.c.bf16 %v778_v41, %v777_v39  ;;  %v1308_v45 = vpack.c.bf16 %v796_v43, %v795_v42  ;;  %v780_v47 = vld [vmem:[%s1802_s28 + $0x18] sm:$0xff]  ;;  %v797_v48 = vld [vmem:[%s1802_s28 + $0xa0] sm:$0xff]  ;;  %v798_v49 = vld [vmem:[%s1802_s28 + $0xa8] sm:$0xff]  ;;  %p1528_p2 = scmp.ne.s32.totalorder %s2028_s0, %s1527_s14 }
  0x37   : > { %1336 = vmatprep.subr.bf16.mxu1 %v1304_v40  ;;  %v1310_v50 = vpack.c.bf16 %v780_v47, %v779_v46  ;;  %v1312_v51 = vpack.c.bf16 %v798_v49, %v797_v48  ;;  %v781_v52 = vld [vmem:[%s1802_s28 + $0x20] sm:$0xff]  ;;  %v782_v53 = vld [vmem:[%s1802_s28 + $0x28] sm:$0xff]  ;;  %v799_v54 = vld [vmem:[%s1802_s28 + $0xb0] sm:$0xff]  ;;  %v335_v14 = vsub.s32 0, %v334_v13  ;;  %v339_v16 = vsub.s32 1, %v334_v13 }
  0x38   : > { %1344 = vmatpush3.bf16.msra.mxu1 %v1306_v44  ;;  %v800_v55 = vld [vmem:[%s1802_s28 + $0xb8] sm:$0xff]  ;;  %v1314_v56 = vpack.c.bf16 %v782_v53, %v781_v52  ;;  %v783_v58 = vld [vmem:[%s1802_s28 + $0x30] sm:$0xff]  ;;  %v801_v60 = vld [vmem:[%s1802_s28 + $0xc0] sm:$0xff]  ;;  %p1529_p3 = pnand %p1528_p2, %p1721_p8 }
  0x39   : > { %1303 = vmatpush1.bf16.msra.mxu0 %v1302_v20  ;;  %1337 = vmatprep.subr.bf16.mxu1 %v1308_v45  ;;  %v1316_v57 = vpack.c.bf16 %v800_v55, %v799_v54  ;;  %v784_v59 = vld [vmem:[%s1802_s28 + $0x38] sm:$0xff]  ;;  %v802_v61 = vld [vmem:[%s1802_s28 + $0xc8] sm:$0xff]  ;;  %v785_v0 = vld [vmem:[%s1802_s28 + $0x40] sm:$0xff] }
  0x3a   : > { %1305 = vmatprep.subr.bf16.mxu0 %v1304_v40  ;;  %v1318_v62 = vpack.c.bf16 %v784_v59, %v783_v58  ;;  %v1320_v63 = vpack.c.bf16 %v802_v61, %v801_v60  ;;  %v786_v1 = vld [vmem:[%s1802_s28 + $0x48] sm:$0xff]  ;;  %v803_v2 = vld [vmem:[%s1802_s28 + $0xd0] sm:$0xff]  ;;  %v804_v3 = vld [vmem:[%s1802_s28 + $0xd8] sm:$0xff]  ;;  %p1530_p4 = pneg %p1529_p3 }
  0x3b   : > { %v1324_v5 = vpack.c.bf16 %v804_v3, %v803_v2  ;;  %v787_v6 = vld [vmem:[%s1802_s28 + $0x50] sm:$0xff]  ;;  %v788_v7 = vld [vmem:[%s1802_s28 + $0x58] sm:$0xff]  ;;  %v805_v8 = vld [vmem:[%s1802_s28 + $0xe0] sm:$0xff] }
  0x3c   : > { %1345 = vmatpush3.bf16.msra.mxu1 %v1310_v50  ;;  %v806_v9 = vld [vmem:[%s1802_s28 + $0xe8] sm:$0xff]  ;;  %v1326_v10 = vpack.c.bf16 %v788_v7, %v787_v6  ;;  %v331_v15 = vld [vmem:[%s313_s16] sm:$0x3]  ;;  %v807_v60 = vld [vmem:[%s1802_s28 + $0xf0] sm:$0xff]  ;;  %s1531_s16 = sshll.u32 %s1624_s15, 4  ;;  %s1532_s16 = int_to_ptr.vmem [resolvable:$false] %s1531_s16 }
  0x3d   : > { %1338 = vmatprep.subr.bf16.mxu1 %v1312_v51  ;;  %v1328_v11 = vpack.c.bf16 %v806_v9, %v805_v8  ;;  %v1834_v17 = vrot.slane %v331_v15, %v335_v14  ;;  %v1836_v18 = vrot.slane %v331_v15, %v339_v16  ;;  %v789_v52 = vld [vmem:[%s1802_s28 + $0x60] sm:$0xff]  ;;  %v790_v53 = vld [vmem:[%s1802_s28 + $0x68] sm:$0xff]  ;;  %v808_v61 = vld [vmem:[%s1802_s28 + $0xf8] sm:$0xff]  ;;  %p1534_p5 = scmp.lt.s32.totalorder %s2028_s0, %s1532_s16 }
  0x3e   : > { %v1330_v55 = vpack.c.bf16 %v790_v53, %v789_v52 }
  0x40   : > { %1346 = vmatpush3.bf16.msra.mxu1 %v1314_v56 }
  0x41   : > { %1339 = vmatprep.subr.bf16.mxu1 %v1316_v57 }
  0x44   : > { %1347 = vmatpush3.bf16.msra.mxu1 %v1318_v62 }
  0x45   : > { %1340 = vmatprep.subr.bf16.mxu1 %v1320_v63 }
  0xa9   : > { %v359_v21 = vpop.trf.xlu0 }
  0xaa   : > { %1193 = vmatmul.mubr.msk.f32.vlgmr.msra.gmra.mrb[0].mxu0 %vm375_vm0, %v359_v21 }
  0xab   : > { %494 = vmatprep.mubr.f32.mxu0 %v1623_v4  ;;  %1307 = vmatpush3.bf16.msra.mxu0 %v1306_v44 }
  0xac   : > { %1309 = vmatprep.subr.bf16.mxu0 %v1308_v45 }
  0xad   : > { %v360_v22 = vpop.trf.xlu0 }
  0xae   : > { %1194 = vmatmul.mubr.msk.f32.gmra.mrb[2].mxu0 %vm375_vm0, %v360_v22 }
  0xaf   : > { %500 = vmatprep.mubr.f32.mxu0 %v1623_v4  ;;  %1311 = vmatpush3.bf16.msra.mxu0 %v1310_v50 }
  0xb0   : > { %1313 = vmatprep.subr.bf16.mxu0 %v1312_v51 }
  0xb1   : > { %v361_v23 = vpop.trf.xlu0 }
  0xb2   : > { %1195 = vmatmul.mubr.msk.f32.gmra.mrb[4].mxu0 %vm375_vm0, %v361_v23 }
  0xb3   : > { %506 = vmatprep.mubr.f32.mxu0 %v1623_v4  ;;  %1315 = vmatpush3.bf16.msra.mxu0 %v1314_v56 }
  0xb4   : > { %1317 = vmatprep.subr.bf16.mxu0 %v1316_v57 }
  0xb5   : > { %v362_v24 = vpop.trf.xlu0 }
  0xb6   : > { %1196 = vmatmul.mubr.msk.f32.gmra.mrb[6].mxu0 %vm375_vm0, %v362_v24 }
  0xb7   : > { %512 = vmatprep.mubr.f32.mxu0 %v1623_v4  ;;  %1319 = vmatpush3.bf16.msra.mxu0 %v1318_v62 }
  0xb8   : > { %1321 = vmatprep.subr.bf16.mxu0 %v1320_v63  ;;  %v1332_v63 = vpack.c.bf16 %v808_v61, %v807_v60 }
  0xb9   : > { %v363_v25 = vpop.trf.xlu0 }
  0xba   : > { %1197 = vmatmul.mubr.msk.f32.gmra.mrb[8].mxu0 %vm375_vm0, %v363_v25 }
  0xbb   : > { %518 = vmatprep.mubr.f32.mxu0 %v1623_v4 }
  0xbd   : > { %v364_v26 = vpop.trf.xlu0 }
  0xbe   : > { %1198 = vmatmul.mubr.msk.f32.gmra.mrb[10].mxu0 %vm375_vm0, %v364_v26 }
  0xbf   : > { %524 = vmatprep.mubr.f32.mxu0 %v1623_v4 }
  0xc1   : > { %v365_v27 = vpop.trf.xlu0 }
  0xc2   : > { %1199 = vmatmul.mubr.msk.f32.gmra.mrb[12].mxu0 %vm375_vm0, %v365_v27 }
  0xc3   : > { %530 = vmatprep.mubr.f32.mxu0 %v1623_v4 }
  0xc5   : > { %v366_v28 = vpop.trf.xlu0 }
  0xc6   : > { %1200 = vmatmul.mubr.msk.f32.gmra.mrb[14].mxu0 %vm375_vm0, %v366_v28 }
  0xc7   : > { %536 = vmatprep.mubr.f32.mxu0 %v1623_v4 }
  0xc9   : > { %v367_v29 = vpop.trf.xlu0 }
  0xca   : > { %1201 = vmatmul.mubr.msk.f32.gmra.mrb[16].mxu0 %vm375_vm0, %v367_v29 }
  0xcb   : > { %542 = vmatprep.mubr.f32.mxu0 %v1623_v4 }
  0xcd   : > { %v368_v30 = vpop.trf.xlu0 }
  0xce   : > { %1202 = vmatmul.mubr.msk.f32.gmra.mrb[18].mxu0 %vm375_vm0, %v368_v30 }
  0xcf   : > { %548 = vmatprep.mubr.f32.mxu0 %v1623_v4 }
  0xd1   : > { %v369_v31 = vpop.trf.xlu0 }
  0xd2   : > { %1203 = vmatmul.mubr.msk.f32.gmra.mrb[20].mxu0 %vm375_vm0, %v369_v31 }
  0xd3   : > { %554 = vmatprep.mubr.f32.mxu0 %v1623_v4 }
  0xd5   : > { %v370_v32 = vpop.trf.xlu0 }
  0xd6   : > { %1204 = vmatmul.mubr.msk.f32.gmra.mrb[22].mxu0 %vm375_vm0, %v370_v32 }
  0xd7   : > { %560 = vmatprep.mubr.f32.mxu0 %v1623_v4 }
  0xd9   : > { %v371_v33 = vpop.trf.xlu0 }
  0xda   : > { %1205 = vmatmul.mubr.msk.f32.gmra.mrb[24].mxu0 %vm375_vm0, %v371_v33 }
  0xdb   : > { %566 = vmatprep.mubr.f32.mxu0 %v1623_v4 }
  0xdd   : > { %v372_v34 = vpop.trf.xlu0 }
  0xde   : > { %1206 = vmatmul.mubr.msk.f32.gmra.mrb[26].mxu0 %vm375_vm0, %v372_v34 }
  0xdf   : > { %572 = vmatprep.mubr.f32.mxu0 %v1623_v4 }
  0xe1   : > { %v373_v35 = vpop.trf.xlu0 }
  0xe2   : > { %1207 = vmatmul.mubr.msk.f32.gmra.mrb[28].mxu0 %vm375_vm0, %v373_v35 }
  0xe3   : > { %578 = vmatprep.mubr.f32.mxu0 %v1623_v4  ;;  %v1322_v4 = vpack.c.bf16 %v786_v1, %v785_v0  ;;  %v791_v0 = vld [vmem:[%s1802_s28 + $0x70] sm:$0xff]  ;;  %v792_v1 = vld [vmem:[%s1802_s28 + $0x78] sm:$0xff]  ;;  %s1211_s28 = sshll.u32 %s1056_s19, 7 }
  0xe4   : > { %s2033_s6 = scalar_lea.hbm %s2095_s5, %s1211_s28 }
  0xe5   : > { %v374_v36 = vpop.trf.xlu0  ;;  %1323 = vmatpush3.bf16.msra.mxu0 %v1322_v4  ;;  %1348 = vmatpush3.bf16.msra.mxu1 %v1322_v4  ;;  %v1334_v4 = vpack.c.bf16 %v792_v1, %v791_v0 }
  0xe6   : > { %1208 = vmatmul.mubr.msk.f32.gmra.mrb[30].mxu0 %vm375_vm0, %v374_v36  ;;  %1325 = vmatprep.subr.bf16.mxu0 %v1324_v5 }
  0xe7   : > { %1341 = vmatprep.subr.bf16.mxu1 %v1324_v5 }
  0xe9   : > { %1327 = vmatpush3.bf16.msra.mxu0 %v1326_v10  ;;  %1349 = vmatpush3.bf16.msra.mxu1 %v1326_v10 }
  0xea   : > { %1329 = vmatprep.subr.bf16.mxu0 %v1328_v11  ;;  %1342 = vmatprep.subr.bf16.mxu1 %v1328_v11 }
  0xed   : > { %1331 = vmatpush3.bf16.msra.mxu0 %v1330_v55  ;;  %1350 = vmatpush3.bf16.msra.mxu1 %v1330_v55 }
  0xee   : > { %1333 = vmatprep.subr.bf16.mxu0 %v1332_v63  ;;  %1343 = vmatprep.subr.bf16.mxu1 %v1332_v63 }
  0xf1   : > { %1335 = vmatpush3.bf16.msra.mxu0 %v1334_v4  ;;  %1351 = vmatpush3.bf16.msra.mxu1 %v1334_v4 }
 0x17d   : > { %v490_v19 = vpop.f32.mrb[0].mxu0 }
 0x17e   : > { %v1839_v20 = vadd.f32 %v490_v19, %v1834_v17  ;;  %v492_v21 = vpop.f32.mrb[1].mxu0 }
 0x17f   : > { %v1842_v22 = vadd.f32 %v492_v21, %v1836_v18 }
 0x181   : > { %v496_v23 = vpop.f32.mrb[2].mxu0  ;;  %v585_v24 = vmax.f32 %v1839_v20, %v1842_v22 }
 0x182   : > { %v1847_v25 = vadd.f32 %v496_v23, %v1834_v17  ;;  %v498_v26 = vpop.f32.mrb[3].mxu0 }
 0x183   : > { %v1850_v27 = vadd.f32 %v498_v26, %v1836_v18  ;;  %586 = vmax.xlane.f32.xlu0 %v585_v24 }
 0x185   : > { %v502_v28 = vpop.f32.mrb[4].mxu0  ;;  %v588_v29 = vmax.f32 %v1847_v25, %v1850_v27 }
 0x186   : > { %v1855_v30 = vadd.f32 %v502_v28, %v1834_v17  ;;  %v504_v31 = vpop.f32.mrb[5].mxu0 }
 0x187   : > { %v1858_v32 = vadd.f32 %v504_v31, %v1836_v18  ;;  %589 = vmax.xlane.f32.xlu1 %v588_v29 }
 0x189   : > { %v508_v33 = vpop.f32.mrb[6].mxu0  ;;  %v591_v34 = vmax.f32 %v1855_v30, %v1858_v32 }
 0x18a   : > { %v1863_v35 = vadd.f32 %v508_v33, %v1834_v17  ;;  %v510_v36 = vpop.f32.mrb[7].mxu0 }
 0x18b   : > { %v1866_v37 = vadd.f32 %v510_v36, %v1836_v18  ;;  %592 = vmax.xlane.f32.xlu1 %v591_v34 }
 0x18d   : > { %v514_v38 = vpop.f32.mrb[8].mxu0  ;;  %v594_v39 = vmax.f32 %v1863_v35, %v1866_v37 }
 0x18e   : > { %v1871_v40 = vadd.f32 %v514_v38, %v1834_v17  ;;  %v516_v41 = vpop.f32.mrb[9].mxu0 }
 0x18f   : > { %v1874_v42 = vadd.f32 %v516_v41, %v1836_v18  ;;  %595 = vmax.xlane.f32.xlu1 %v594_v39 }
 0x191   : > { %v520_v43 = vpop.f32.mrb[10].mxu0  ;;  %v597_v44 = vmax.f32 %v1871_v40, %v1874_v42 }
 0x192   : > { %v1879_v45 = vadd.f32 %v520_v43, %v1834_v17  ;;  %v522_v46 = vpop.f32.mrb[11].mxu0 }
 0x193   : > { %v1882_v47 = vadd.f32 %v522_v46, %v1836_v18  ;;  %598 = vmax.xlane.f32.xlu1 %v597_v44 }
 0x195   : > { %v526_v48 = vpop.f32.mrb[12].mxu0  ;;  %v600_v49 = vmax.f32 %v1879_v45, %v1882_v47 }
 0x196   : > { %v1887_v50 = vadd.f32 %v526_v48, %v1834_v17  ;;  %v528_v51 = vpop.f32.mrb[13].mxu0 }
 0x197   : > { %v1892_v54 = vadd.f32 %v528_v51, %v1836_v18  ;;  %601 = vmax.xlane.f32.xlu1 %v600_v49 }
 0x199   : > { %v532_v56 = vpop.f32.mrb[14].mxu0  ;;  %v603_v57 = vmax.f32 %v1887_v50, %v1892_v54 }
 0x19a   : > { %v1897_v58 = vadd.f32 %v532_v56, %v1834_v17  ;;  %v534_v59 = vpop.f32.mrb[15].mxu0 }
 0x19b   : > { %v1902_v62 = vadd.f32 %v534_v59, %v1836_v18  ;;  %604 = vmax.xlane.f32.xlu1 %v603_v57 }
 0x19d   : > { %v538_v2 = vpop.f32.mrb[16].mxu0  ;;  %v606_v3 = vmax.f32 %v1897_v58, %v1902_v62 }
 0x19e   : > { %v1909_v5 = vadd.f32 %v538_v2, %v1834_v17  ;;  %v540_v6 = vpop.f32.mrb[17].mxu0 }
 0x19f   : > { %v1912_v7 = vadd.f32 %v540_v6, %v1836_v18  ;;  %607 = vmax.xlane.f32.xlu1 %v606_v3 }
 0x1a1   : > { %v544_v8 = vpop.f32.mrb[18].mxu0  ;;  %v609_v9 = vmax.f32 %v1909_v5, %v1912_v7 }
 0x1a2   : > { %v1917_v10 = vadd.f32 %v544_v8, %v1834_v17  ;;  %v546_v11 = vpop.f32.mrb[19].mxu0 }
 0x1a3   : > { %v1920_v12 = vadd.f32 %v546_v11, %v1836_v18  ;;  %610 = vmax.xlane.f32.xlu1 %v609_v9 }
 0x1a5   : > { %v550_v13 = vpop.f32.mrb[20].mxu0  ;;  %v612_v14 = vmax.f32 %v1917_v10, %v1920_v12 }
 0x1a6   : > { %v1925_v15 = vadd.f32 %v550_v13, %v1834_v17  ;;  %v552_v16 = vpop.f32.mrb[21].mxu0 }
 0x1a7   : > { %v1928_v19 = vadd.f32 %v552_v16, %v1836_v18  ;;  %613 = vmax.xlane.f32.xlu1 %v612_v14 }
 0x1a9   : > { %v556_v21 = vpop.f32.mrb[22].mxu0  ;;  %v615_v23 = vmax.f32 %v1925_v15, %v1928_v19 }
 0x1aa   : > { %v1933_v24 = vadd.f32 %v556_v21, %v1834_v17  ;;  %v558_v26 = vpop.f32.mrb[23].mxu0 }
 0x1ab   : > { %v1936_v28 = vadd.f32 %v558_v26, %v1836_v18  ;;  %616 = vmax.xlane.f32.xlu1 %v615_v23 }
 0x1ad   : > { %v562_v29 = vpop.f32.mrb[24].mxu0  ;;  %v618_v31 = vmax.f32 %v1933_v24, %v1936_v28 }
 0x1ae   : > { %v1941_v33 = vadd.f32 %v562_v29, %v1834_v17  ;;  %v564_v34 = vpop.f32.mrb[25].mxu0 }
 0x1af   : > { %v1944_v36 = vadd.f32 %v564_v34, %v1836_v18  ;;  %619 = vmax.xlane.f32.xlu1 %v618_v31 }
 0x1b1   : > { %v568_v38 = vpop.f32.mrb[26].mxu0  ;;  %v621_v39 = vmax.f32 %v1941_v33, %v1944_v36 }
 0x1b2   : > { %v1949_v41 = vadd.f32 %v568_v38, %v1834_v17  ;;  %v570_v43 = vpop.f32.mrb[27].mxu0 }
 0x1b3   : > { %v1952_v44 = vadd.f32 %v570_v43, %v1836_v18  ;;  %622 = vmax.xlane.f32.xlu1 %v621_v39 }
 0x1b5   : > { %v574_v46 = vpop.f32.mrb[28].mxu0  ;;  %v624_v48 = vmax.f32 %v1949_v41, %v1952_v44 }
 0x1b6   : > { %v1957_v49 = vadd.f32 %v574_v46, %v1834_v17  ;;  %v576_v51 = vpop.f32.mrb[29].mxu0 }
 0x1b7   : > { %v1960_v52 = vadd.f32 %v576_v51, %v1836_v18  ;;  %625 = vmax.xlane.f32.xlu1 %v624_v48 }
 0x1b9   : > { %v580_v53 = vpop.f32.mrb[30].mxu0  ;;  %v627_v55 = vmax.f32 %v1957_v49, %v1960_v52 }
 0x1ba   : > { %v1965_v56 = vadd.f32 %v580_v53, %v1834_v17  ;;  %v582_v57 = vpop.f32.mrb[31].mxu0 }
 0x1bb   : > { %v1968_v59 = vadd.f32 %v582_v57, %v1836_v18  ;;  %628 = vmax.xlane.f32.xlu1 %v627_v55 }
 0x1bd   : > { %v630_v60 = vmax.f32 %v1965_v56, %v1968_v59 }
 0x1bf   : > { %631 = vmax.xlane.f32.xlu1 %v630_v60 }
 0x210   : > { %v587_v61 = vpop.xlane.xlu0 %586 }
 0x211   : > { %v633_v63 = vsub.f32 %v1839_v20, %v587_v61  ;;  %v634_v0 = vsub.f32 %v1842_v22, %v587_v61 }
 0x213   : > { %v665_v1 = vmul.f32 1.442695, %v633_v63  ;;  %v667_v2 = vmul.f32 1.442695, %v634_v0 }
 0x214   : > { %v590_v3 = vpop.xlane.xlu1 %589 }
 0x215   : > { %1427 = vpow2.f32 %v665_v1  ;;  %v635_v17 = vsub.f32 %v1847_v25, %v590_v3  ;;  %v636_v4 = vsub.f32 %v1850_v27, %v590_v3 }
 0x216   : > { %1429 = vpow2.f32 %v667_v2 }
 0x217   : > { %v669_v18 = vmul.f32 1.442695, %v635_v17  ;;  %v671_v6 = vmul.f32 1.442695, %v636_v4 }
 0x218   : > { %v593_v8 = vpop.xlane.xlu1 %592 }
 0x219   : > { %1431 = vpow2.f32 %v669_v18  ;;  %v637_v9 = vsub.f32 %v1855_v30, %v593_v8  ;;  %v638_v11 = vsub.f32 %v1858_v32, %v593_v8 }
 0x21a   : > { %1433 = vpow2.f32 %v671_v6 }
 0x21b   : > { %v673_v20 = vmul.f32 1.442695, %v637_v9  ;;  %v675_v22 = vmul.f32 1.442695, %v638_v11 }
 0x21c   : > { %v596_v13 = vpop.xlane.xlu1 %595 }
 0x21d   : > { %1435 = vpow2.f32 %v673_v20  ;;  %v639_v14 = vsub.f32 %v1863_v35, %v596_v13  ;;  %v640_v25 = vsub.f32 %v1866_v37, %v596_v13 }
 0x21e   : > { %1437 = vpow2.f32 %v675_v22 }
 0x21f   : > { %v1428_v27 = vpop.eup %1427  ;;  %v677_v16 = vmul.f32 1.442695, %v639_v14  ;;  %v679_v21 = vmul.f32 1.442695, %v640_v25 }
 0x220   : > { %v1430_v23 = vpop.eup %1429  ;;  %v599_v26 = vpop.xlane.xlu1 %598 }
 0x221   : > { %1439 = vpow2.f32 %v677_v16  ;;  %v641_v30 = vsub.f32 %v1871_v40, %v599_v26  ;;  %v642_v32 = vsub.f32 %v1874_v42, %v599_v26  ;;  %873 = vmatprep.mubr.f32.mxu0 %v1430_v23  ;;  %v729_v29 = vadd.f32 %v1430_v23, %v1428_v27 }
 0x222   : > { %1441 = vpow2.f32 %v679_v21  ;;  %874 = vmatmul.mubr.f32.vlgmr.msra.gmra.mrb[32].mxu0 %v1428_v27 }
 0x223   : > { %v1432_v31 = vpop.eup %1431  ;;  %v681_v34 = vmul.f32 1.442695, %v641_v30  ;;  %v683_v35 = vmul.f32 1.442695, %v642_v32  ;;  %730 = vadd.xlane.f32.xlu1 %v729_v29 }
 0x224   : > { %v1434_v37 = vpop.eup %1433  ;;  %v602_v38 = vpop.xlane.xlu1 %601 }
 0x225   : > { %1443 = vpow2.f32 %v681_v34  ;;  %v643_v39 = vsub.f32 %v1879_v45, %v602_v38  ;;  %v644_v43 = vsub.f32 %v1882_v47, %v602_v38  ;;  %878 = vmatprep.mubr.f32.mxu0 %v1434_v37  ;;  %v732_v46 = vadd.f32 %v1434_v37, %v1432_v31 }
 0x226   : > { %1445 = vpow2.f32 %v683_v35  ;;  %879 = vmatmul.mubr.f32.gmra.mrb[34].mxu0 %v1432_v31 }
 0x227   : > { %v1436_v40 = vpop.eup %1435  ;;  %v685_v42 = vmul.f32 1.442695, %v643_v39  ;;  %v687_v48 = vmul.f32 1.442695, %v644_v43  ;;  %733 = vadd.xlane.f32.xlu1 %v732_v46 }
 0x228   : > { %v1438_v51 = vpop.eup %1437  ;;  %v605_v53 = vpop.xlane.xlu1 %604 }
 0x229   : > { %1447 = vpow2.f32 %v685_v42  ;;  %v645_v55 = vsub.f32 %v1887_v50, %v605_v53  ;;  %v646_v57 = vsub.f32 %v1892_v54, %v605_v53  ;;  %883 = vmatprep.mubr.f32.mxu0 %v1438_v51  ;;  %v735_v60 = vadd.f32 %v1438_v51, %v1436_v40 }
 0x22a   : > { %1449 = vpow2.f32 %v687_v48  ;;  %884 = vmatmul.mubr.f32.gmra.mrb[36].mxu0 %v1436_v40 }
 0x22b   : > { %v1440_v45 = vpop.eup %1439  ;;  %v689_v47 = vmul.f32 1.442695, %v645_v55  ;;  %v691_v61 = vmul.f32 1.442695, %v646_v57  ;;  %736 = vadd.xlane.f32.xlu1 %v735_v60 }
 0x22c   : > { %v1442_v63 = vpop.eup %1441  ;;  %v608_v0 = vpop.xlane.xlu1 %607 }
 0x22d   : > { %1451 = vpow2.f32 %v689_v47  ;;  %888 = vmatprep.mubr.f32.mxu1 %v1442_v63  ;;  %v647_v1 = vsub.f32 %v1897_v58, %v608_v0  ;;  %v648_v2 = vsub.f32 %v1902_v62, %v608_v0  ;;  %v738_v3 = vadd.f32 %v1442_v63, %v1440_v45 }
 0x22e   : > { %1453 = vpow2.f32 %v691_v61  ;;  %889 = vmatmul.mubr.f32.vlgmr.msra.gmra.mrb[0].mxu1 %v1440_v45 }
 0x22f   : > { %v1444_v50 = vpop.eup %1443  ;;  %v693_v54 = vmul.f32 1.442695, %v647_v1  ;;  %v695_v17 = vmul.f32 1.442695, %v648_v2  ;;  %739 = vadd.xlane.f32.xlu1 %v738_v3 }
 0x230   : > { %v1446_v4 = vpop.eup %1445  ;;  %v611_v18 = vpop.xlane.xlu1 %610 }
 0x231   : > { %1455 = vpow2.f32 %v693_v54  ;;  %893 = vmatprep.mubr.f32.mxu1 %v1446_v4  ;;  %v649_v6 = vsub.f32 %v1909_v5, %v611_v18  ;;  %v650_v8 = vsub.f32 %v1912_v7, %v611_v18  ;;  %v741_v9 = vadd.f32 %v1446_v4, %v1444_v50 }
 0x232   : > { %1457 = vpow2.f32 %v695_v17  ;;  %894 = vmatmul.mubr.f32.gmra.mrb[2].mxu1 %v1444_v50 }
 0x233   : > { %v1448_v58 = vpop.eup %1447  ;;  %v697_v62 = vmul.f32 1.442695, %v649_v6  ;;  %v699_v11 = vmul.f32 1.442695, %v650_v8  ;;  %742 = vadd.xlane.f32.xlu1 %v741_v9 }
 0x234   : > { %v1450_v20 = vpop.eup %1449  ;;  %v614_v22 = vpop.xlane.xlu1 %613 }
 0x235   : > { %1459 = vpow2.f32 %v697_v62  ;;  %898 = vmatprep.mubr.f32.mxu1 %v1450_v20  ;;  %v651_v13 = vsub.f32 %v1917_v10, %v614_v22  ;;  %v652_v14 = vsub.f32 %v1920_v12, %v614_v22  ;;  %v744_v25 = vadd.f32 %v1450_v20, %v1448_v58 }
 0x236   : > { %1461 = vpow2.f32 %v699_v11  ;;  %899 = vmatmul.mubr.f32.gmra.mrb[4].mxu1 %v1448_v58 }
 0x237   : > { %v1452_v5 = vpop.eup %1451  ;;  %v701_v7 = vmul.f32 1.442695, %v651_v13  ;;  %v703_v27 = vmul.f32 1.442695, %v652_v14  ;;  %745 = vadd.xlane.f32.xlu1 %v744_v25 }
 0x238   : > { %v1454_v16 = vpop.eup %1453  ;;  %v617_v21 = vpop.xlane.xlu1 %616 }
 0x239   : > { %1463 = vpow2.f32 %v701_v7  ;;  %903 = vmatprep.mubr.f32.mxu1 %v1454_v16  ;;  %v653_v23 = vsub.f32 %v1925_v15, %v617_v21  ;;  %v654_v26 = vsub.f32 %v1928_v19, %v617_v21  ;;  %v747_v30 = vadd.f32 %v1454_v16, %v1452_v5 }
 0x23a   : > { %1465 = vpow2.f32 %v703_v27  ;;  %904 = vmatmul.mubr.f32.gmra.mrb[6].mxu1 %v1452_v5 }
 0x23b   : > { %v1456_v10 = vpop.eup %1455  ;;  %v705_v12 = vmul.f32 1.442695, %v653_v23  ;;  %v707_v32 = vmul.f32 1.442695, %v654_v26  ;;  %748 = vadd.xlane.f32.xlu1 %v747_v30  ;;  %v2004_v26 = vstv %s954_s12  ;;  %s1533_s12 = scalar_lea.vmem %s1532_s16, 1024 }
 0x23c   : > { %v1458_v29 = vpop.eup %1457  ;;  %v620_v31 = vpop.xlane.xlu1 %619  ;;  %p1535_p6 = scmp.lt.s32.totalorder %s1533_s12, %s1527_s14 }
 0x23d   : > { %1467 = vpow2.f32 %v705_v12  ;;  %908 = vmatprep.mubr.f32.mxu1 %v1458_v29  ;;  %v655_v34 = vsub.f32 %v1933_v24, %v620_v31  ;;  %v656_v35 = vsub.f32 %v1936_v28, %v620_v31  ;;  %v750_v37 = vadd.f32 %v1458_v29, %v1456_v10 }
 0x23e   : > { %1469 = vpow2.f32 %v707_v32  ;;  %909 = vmatmul.mubr.f32.gmra.mrb[8].mxu1 %v1456_v10  ;;  %p1536_p7 = por %p1535_p6, %p1534_p5 }
 0x23f   : > { %v1460_v15 = vpop.eup %1459  ;;  %v709_v19 = vmul.f32 1.442695, %v655_v34  ;;  %v711_v38 = vmul.f32 1.442695, %v656_v35  ;;  %751 = vadd.xlane.f32.xlu1 %v750_v37 }
 0x240   : > { %v1462_v39 = vpop.eup %1461  ;;  %v623_v43 = vpop.xlane.xlu1 %622  ;;  %p1537_p10 = pnand %p1536_p7, %p1530_p4 }
 0x241   : > { %1471 = vpow2.f32 %v709_v19  ;;  %913 = vmatprep.mubr.f32.mxu1 %v1462_v39  ;;  %v657_v46 = vsub.f32 %v1941_v33, %v623_v43  ;;  %v658_v40 = vsub.f32 %v1944_v36, %v623_v43  ;;  %v753_v42 = vadd.f32 %v1462_v39, %v1460_v15 }
 0x242   : > { %1473 = vpow2.f32 %v711_v38  ;;  %914 = vmatmul.mubr.f32.gmra.mrb[10].mxu1 %v1460_v15 }
 0x243   : > { %v1464_v24 = vpop.eup %1463  ;;  %v713_v28 = vmul.f32 1.442695, %v657_v46  ;;  %v715_v48 = vmul.f32 1.442695, %v658_v40  ;;  %754 = vadd.xlane.f32.xlu1 %v753_v42 }
 0x244   : > { %v1466_v51 = vpop.eup %1465  ;;  %v626_v53 = vpop.xlane.xlu1 %625 }
 0x245   : > { %1475 = vpow2.f32 %v713_v28  ;;  %918 = vmatprep.mubr.f32.mxu1 %v1466_v51  ;;  %v659_v55 = vsub.f32 %v1949_v41, %v626_v53  ;;  %v660_v57 = vsub.f32 %v1952_v44, %v626_v53  ;;  %v756_v60 = vadd.f32 %v1466_v51, %v1464_v24 }
 0x246   : > { %1477 = vpow2.f32 %v715_v48  ;;  %919 = vmatmul.mubr.f32.gmra.mrb[12].mxu1 %v1464_v24 }
 0x247   : > { %v1468_v33 = vpop.eup %1467  ;;  %v717_v36 = vmul.f32 1.442695, %v659_v55  ;;  %v719_v45 = vmul.f32 1.442695, %v660_v57  ;;  %757 = vadd.xlane.f32.xlu1 %v756_v60 }
 0x248   : > { %v1470_v47 = vpop.eup %1469  ;;  %v629_v61 = vpop.xlane.xlu1 %628 }
 0x249   : > { %1479 = vpow2.f32 %v717_v36  ;;  %923 = vmatprep.mubr.f32.mxu1 %v1470_v47  ;;  %v661_v63 = vsub.f32 %v1957_v49, %v629_v61  ;;  %v662_v0 = vsub.f32 %v1960_v52, %v629_v61  ;;  %v759_v1 = vadd.f32 %v1470_v47, %v1468_v33 }
 0x24a   : > { %1481 = vpow2.f32 %v719_v45  ;;  %924 = vmatmul.mubr.f32.gmra.mrb[14].mxu1 %v1468_v33 }
 0x24b   : > { %v1472_v41 = vpop.eup %1471  ;;  %v721_v44 = vmul.f32 1.442695, %v661_v63  ;;  %v723_v2 = vmul.f32 1.442695, %v662_v0  ;;  %760 = vadd.xlane.f32.xlu1 %v759_v1 }
 0x24c   : > { %v1474_v3 = vpop.eup %1473  ;;  %v632_v50 = vpop.xlane.xlu1 %631 }
 0x24d   : > { %1483 = vpow2.f32 %v721_v44  ;;  %928 = vmatprep.mubr.f32.mxu1 %v1474_v3  ;;  %v663_v54 = vsub.f32 %v1965_v56, %v632_v50  ;;  %v664_v17 = vsub.f32 %v1968_v59, %v632_v50  ;;  %v762_v4 = vadd.f32 %v1474_v3, %v1472_v41 }
 0x24e   : > { %1485 = vpow2.f32 %v723_v2  ;;  %929 = vmatmul.mubr.f32.gmra.mrb[16].mxu1 %v1472_v41 }
 0x24f   : > { %v1476_v49 = vpop.eup %1475  ;;  %v725_v52 = vmul.f32 1.442695, %v663_v54  ;;  %v727_v18 = vmul.f32 1.442695, %v664_v17  ;;  %763 = vadd.xlane.f32.xlu1 %v762_v4 }
 0x250   : > { %v1478_v6 = vpop.eup %1477 }
 0x251   : > { %1487 = vpow2.f32 %v725_v52  ;;  %933 = vmatprep.mubr.f32.mxu1 %v1478_v6  ;;  %v765_v8 = vadd.f32 %v1478_v6, %v1476_v49 }
 0x252   : > { %1489 = vpow2.f32 %v727_v18  ;;  %934 = vmatmul.mubr.f32.gmra.mrb[18].mxu1 %v1476_v49 }
 0x253   : > { %v1480_v9 = vpop.eup %1479  ;;  %766 = vadd.xlane.f32.xlu1 %v765_v8 }
 0x254   : > { %v1482_v58 = vpop.eup %1481 }
 0x255   : > { %938 = vmatprep.mubr.f32.mxu1 %v1482_v58  ;;  %v768_v56 = vadd.f32 %v1482_v58, %v1480_v9 }
 0x256   : > { %939 = vmatmul.mubr.f32.gmra.mrb[20].mxu1 %v1480_v9 }
 0x257   : > { %v1484_v59 = vpop.eup %1483  ;;  %769 = vadd.xlane.f32.xlu0 %v768_v56 }
 0x258   : > { %v1486_v62 = vpop.eup %1485 }
 0x259   : > { %943 = vmatprep.mubr.f32.mxu1 %v1486_v62  ;;  %v771_v11 = vadd.f32 %v1486_v62, %v1484_v59 }
 0x25a   : > { %944 = vmatmul.mubr.f32.gmra.mrb[22].mxu1 %v1484_v59 }
 0x25b   : > { %v1488_v20 = vpop.eup %1487  ;;  %772 = vadd.xlane.f32.xlu1 %v771_v11 }
 0x25c   : > { %v1490_v22 = vpop.eup %1489 }
 0x25d   : > { %948 = vmatprep.mubr.f32.mxu1 %v1490_v22  ;;  %v774_v13 = vadd.f32 %v1490_v22, %v1488_v20 }
 0x25e   : > { %949 = vmatmul.mubr.f32.gmra.mrb[24].mxu1 %v1488_v20 }
 0x25f   : > { %775 = vadd.xlane.f32.xlu0 %v774_v13 }
 0x2b0   : > { %v731_v14 = vpop.xlane.xlu1 %730 }
 0x2b1   : > { %1491 = vrcp.f32 %v731_v14 }
 0x2b4   : > { %v734_v25 = vpop.xlane.xlu1 %733 }
 0x2b5   : > { %1493 = vrcp.f32 %v734_v25 }
 0x2b8   : > { %v737_v5 = vpop.xlane.xlu1 %736 }
 0x2b9   : > { %1495 = vrcp.f32 %v737_v5 }
 0x2bb   : > { %v1492_v23 = vpop.eup %1491 }
 0x2bc   : > { %v740_v7 = vpop.xlane.xlu1 %739  ;;  %v972_v32 = vmul.f32 %v1492_v23, %v2004_v26 }
 0x2bd   : > { %1497 = vrcp.f32 %v740_v7 }
 0x2bf   : > { %v1494_v29 = vpop.eup %1493 }
 0x2c0   : > { %v743_v27 = vpop.xlane.xlu1 %742  ;;  %v973_v19 = vmul.f32 %v1494_v29, %v2004_v26 }
 0x2c1   : > { %1499 = vrcp.f32 %v743_v27 }
 0x2c3   : > { %v1496_v38 = vpop.eup %1495 }
 0x2c4   : > { %v746_v16 = vpop.xlane.xlu1 %745  ;;  %v974_v24 = vmul.f32 %v1496_v38, %v2004_v26 }
 0x2c5   : > { %1501 = vrcp.f32 %v746_v16 }
 0x2c7   : > { %v1498_v28 = vpop.eup %1497 }
 0x2c8   : > { %v749_v21 = vpop.xlane.xlu1 %748  ;;  %v975_v57 = vmul.f32 %v1498_v28, %v2004_v26 }
 0x2c9   : > { %1503 = vrcp.f32 %v749_v21 }
 0x2cb   : > { %v1500_v60 = vpop.eup %1499 }
 0x2cc   : > { %v752_v31 = vpop.xlane.xlu1 %751  ;;  %v976_v63 = vmul.f32 %v1500_v60, %v2004_v26 }
 0x2cd   : > { %1505 = vrcp.f32 %v752_v31 }
 0x2cf   : > { %v1502_v0 = vpop.eup %1501 }
 0x2d0   : > { %v755_v40 = vpop.xlane.xlu1 %754  ;;  %v977_v50 = vmul.f32 %v1502_v0, %v2004_v26 }
 0x2d1   : > { %1507 = vrcp.f32 %v755_v40 }
 0x2d3   : > { %v1504_v54 = vpop.eup %1503 }
 0x2d4   : > { %v758_v33 = vpop.xlane.xlu1 %757  ;;  %v978_v18 = vmul.f32 %v1504_v54, %v2004_v26 }
 0x2d5   : > { %1509 = vrcp.f32 %v758_v33 }
 0x2d7   : > { %v1506_v6 = vpop.eup %1505 }
 0x2d8   : > { %v761_v2 = vpop.xlane.xlu1 %760  ;;  %v979_v62 = vmul.f32 %v1506_v6, %v2004_v26 }
 0x2d9   : > { %1511 = vrcp.f32 %v761_v2 }
 0x2db   : > { %v1508_v11 = vpop.eup %1507 }
 0x2dc   : > { %v764_v8 = vpop.xlane.xlu1 %763  ;;  %v980_v5 = vmul.f32 %v1508_v11, %v2004_v26 }
 0x2dd   : > { %1513 = vrcp.f32 %v764_v8  ;;  %v1524_v8 = vld [vmem:[%s1754_s11 + $0x8] sm:$0xff] }
 0x2df   : > { %v1510_v7 = vpop.eup %1509 }
 0x2e0   : > { %v767_v14 = vpop.xlane.xlu1 %766 }
 0x2e1   : > { %1515 = vrcp.f32 %v767_v14 }
 0x2e4   : > { %v770_v23 = vpop.xlane.xlu0 %769 }
 0x2e5   : > { %1517 = vrcp.f32 %v770_v23 }
 0x2f5   : > { %v1248_v30 = vpop.f32.mrb[32].mxu0 }
 0x2f6   : > { %v1249_v10 = vpop.f32.mrb[33].mxu0 }
 0x2f7   : > { %v1250_v12 = vadd.f32 %v1249_v10, %v1248_v30  ;;  %v981_v10 = vmul.f32 %v1510_v7, %v2004_v26 }
 0x2f9   : > { %v1251_v34 = vpop.f32.mrb[34].mxu0  ;;  %v988_v35 = vmul.f32 %v1250_v12, %v972_v32  ;;  %v1512_v12 = vpop.eup %1511 }
 0x2fa   : > { %v1252_v37 = vpop.f32.mrb[35].mxu0 }
 0x2fb   : > { %v1253_v15 = vadd.f32 %v1252_v37, %v1251_v34  ;;  %1004 = vxpose.xlu1.b32.start [1/16] (narrow) %v988_v35, 32  ;;  %v773_v34 = vpop.xlane.xlu1 %772  ;;  %v982_v37 = vmul.f32 %v1512_v12, %v2004_v26 }
 0x2fc   : > { %1519 = vrcp.f32 %v773_v34 }
 0x2fd   : > { %v989_v39 = vmul.f32 %v1253_v15, %v973_v19  ;;  %v1254_v43 = vpop.f32.mrb[36].mxu0  ;;  %v1514_v15 = vpop.eup %1513 }
 0x2fe   : > { %v1255_v46 = vpop.f32.mrb[37].mxu0  ;;  %v983_v40 = vmul.f32 %v1514_v15, %v2004_v26 }
 0x2ff   : > { %v1256_v42 = vadd.f32 %v1255_v46, %v1254_v43  ;;  %1005 = vxpose.xlu1.b32.cont [2/16] (narrow) %v989_v39, 32  ;;  %v776_v43 = vpop.xlane.xlu0 %775 }
 0x300   : > { %1521 = vrcp.f32 %v776_v43 }
 0x301   : > { %v990_v48 = vmul.f32 %v1256_v42, %v974_v24  ;;  %v1257_v51 = vpop.f32.mrb[0].mxu1  ;;  %v1516_v42 = vpop.eup %1515 }
 0x302   : > { %v1258_v53 = vpop.f32.mrb[1].mxu1 }
 0x303   : > { %v1259_v55 = vadd.f32 %v1258_v53, %v1257_v51  ;;  %1006 = vxpose.xlu1.b32.cont [3/16] (narrow) %v990_v48, 32  ;;  %v984_v53 = vmul.f32 %v1516_v42, %v2004_v26 }
 0x305   : > { %v991_v36 = vmul.f32 %v1259_v55, %v975_v57  ;;  %v1260_v45 = vpop.f32.mrb[2].mxu1  ;;  %v1518_v55 = vpop.eup %1517 }
 0x306   : > { %v1261_v47 = vpop.f32.mrb[3].mxu1 }
 0x307   : > { %v1262_v61 = vadd.f32 %v1261_v47, %v1260_v45  ;;  %1007 = vxpose.xlu1.b32.cont [4/16] (narrow) %v991_v36, 32  ;;  %v985_v45 = vmul.f32 %v1518_v55, %v2004_v26  ;;  %v1520_v47 = vpop.eup %1519 }
 0x309   : > { %v992_v1 = vmul.f32 %v1262_v61, %v976_v63  ;;  %v1263_v41 = vpop.f32.mrb[4].mxu1 }
 0x30a   : > { %v1264_v44 = vpop.f32.mrb[5].mxu1 }
 0x30b   : > { %v1265_v3 = vadd.f32 %v1264_v44, %v1263_v41  ;;  %1008 = vxpose.xlu1.b32.cont [5/16] (narrow) %v992_v1, 32  ;;  %v986_v41 = vmul.f32 %v1520_v47, %v2004_v26  ;;  %v1522_v44 = vpop.eup %1521 }
 0x30d   : > { %v993_v17 = vmul.f32 %v1265_v3, %v977_v50  ;;  %v1266_v4 = vpop.f32.mrb[6].mxu1 }
 0x30e   : > { %v1267_v49 = vpop.f32.mrb[7].mxu1 }
 0x30f   : > { %v1268_v52 = vadd.f32 %v1267_v49, %v1266_v4  ;;  %1009 = vxpose.xlu1.b32.cont [6/16] (narrow) %v993_v17, 32  ;;  %v987_v17 = vmul.f32 %v1522_v44, %v2004_v26 }
 0x311   : > { %v994_v9 = vmul.f32 %v1268_v52, %v978_v18  ;;  %v1269_v58 = vpop.f32.mrb[8].mxu1  ;;  %v1523_v52 = vld [vmem:[%s1754_s11] sm:$0xff] }
 0x312   : > { %v1270_v56 = vpop.f32.mrb[9].mxu1 }
 0x313   : > { %v1271_v59 = vadd.f32 %v1270_v56, %v1269_v58  ;;  %1010 = vxpose.xlu1.b32.cont [7/16] (narrow) %v994_v9, 32  ;;  %v1525_v58 = vld [vmem:[%s1754_s11 + $0x10] sm:$0xff] }
 0x315   : > { %v995_v20 = vmul.f32 %v1271_v59, %v979_v62  ;;  %v1272_v22 = vpop.f32.mrb[10].mxu1  ;;  %v1526_v62 = vld [vmem:[%s1754_s11 + $0x18] sm:$0xff] }
 0x316   : > { %v1273_v13 = vpop.f32.mrb[11].mxu1 }
 0x317   : > { %v1274_v25 = vadd.f32 %v1273_v13, %v1272_v22  ;;  %1011 = vxpose.xlu1.b32.cont [8/16] (narrow) %v995_v20, 32 }
 0x319   : > { %v996_v27 = vmul.f32 %v1274_v25, %v980_v5  ;;  %v1275_v16 = vpop.f32.mrb[12].mxu1 }
 0x31a   : > { %v1276_v21 = vpop.f32.mrb[13].mxu1 }
 0x31b   : > { %v1277_v30 = vadd.f32 %v1276_v21, %v1275_v16  ;;  %1012 = vxpose.xlu1.b32.cont [9/16] (narrow) %v996_v27, 32 }
 0x31d   : > { %v997_v32 = vmul.f32 %v1277_v30, %v981_v10  ;;  %v1278_v29 = vpop.f32.mrb[14].mxu1 }
 0x31e   : > { %v1279_v31 = vpop.f32.mrb[15].mxu1 }
 0x31f   : > { %v1280_v35 = vadd.f32 %v1279_v31, %v1278_v29  ;;  %1013 = vxpose.xlu1.b32.cont [10/16] (narrow) %v997_v32, 32 }
 0x321   : > { %v998_v19 = vmul.f32 %v1280_v35, %v982_v37  ;;  %v1281_v38 = vpop.f32.mrb[16].mxu1 }
 0x322   : > { %v1282_v39 = vpop.f32.mrb[17].mxu1 }
 0x323   : > { %v1283_v46 = vadd.f32 %v1282_v39, %v1281_v38  ;;  %1014 = vxpose.xlu1.b32.cont [11/16] (narrow) %v998_v19, 32 }
 0x325   : > { %v999_v24 = vmul.f32 %v1283_v46, %v983_v40  ;;  %v1284_v28 = vpop.f32.mrb[18].mxu1 }
 0x326   : > { %v1285_v48 = vpop.f32.mrb[19].mxu1 }
 0x327   : > { %v1286_v51 = vadd.f32 %v1285_v48, %v1284_v28  ;;  %1015 = vxpose.xlu1.b32.cont [12/16] (narrow) %v999_v24, 32 }
 0x329   : > { %v1000_v57 = vmul.f32 %v1286_v51, %v984_v53  ;;  %v1287_v60 = vpop.f32.mrb[20].mxu1 }
 0x32a   : > { %v1288_v33 = vpop.f32.mrb[21].mxu1 }
 0x32b   : > { %v1289_v36 = vadd.f32 %v1288_v33, %v1287_v60  ;;  %1016 = vxpose.xlu1.b32.cont [13/16] (narrow) %v1000_v57, 32 }
 0x32d   : > { %v1001_v61 = vmul.f32 %v1289_v36, %v985_v45  ;;  %v1290_v63 = vpop.f32.mrb[22].mxu1 }
 0x32e   : > { %v1291_v0 = vpop.f32.mrb[23].mxu1 }
 0x32f   : > { %v1292_v1 = vadd.f32 %v1291_v0, %v1290_v63  ;;  %1017 = vxpose.xlu1.b32.cont [14/16] (narrow) %v1001_v61, 32 }
 0x331   : > { %v1002_v2 = vmul.f32 %v1292_v1, %v986_v41  ;;  %v1293_v3 = vpop.f32.mrb[24].mxu1 }
 0x332   : > { %v1294_v50 = vpop.f32.mrb[25].mxu1 }
 0x333   : > { %v1295_v54 = vadd.f32 %v1294_v50, %v1293_v3  ;;  %1018 = vxpose.xlu1.b32.cont [15/16] (narrow) %v1002_v2, 32 }
 0x335   : > { %v1003_v4 = vmul.f32 %v1295_v54, %v987_v17 }
 0x337   : > { %1019 = vxpose.xlu1.b32.end [16/16] (narrow) %v1003_v4, 32 }
 0x37b   : > { %v1020_v49 = vpop.trf.xlu1 }
 0x37c   : > { %v1036_v18 = vadd.f32 %v1523_v52, %v1020_v49 }
 0x37e   : > { %1040 = vst [vmem:[%s304_s17] sm:$0xff] %v1036_v18 }
 0x37f   : > { %v1021_v6 = vpop.trf.xlu1 }
 0x380   : > { %v1037_v9 = vadd.f32 %v1524_v8, %v1021_v6 }
 0x382   : > { %1041 = vst [vmem:[%s304_s17 + $0x8] sm:$0xff] %v1037_v9 }
 0x383   : > { %v1022_v26 = vpop.trf.xlu1 }
 0x384   : > { %v1038_v56 = vadd.f32 %v1525_v58, %v1022_v26 }
 0x386   : > { %1042 = vst [vmem:[%s304_s17 + $0x10] sm:$0xff] %v1038_v56 }
 0x387   : > { %v1023_v59 = vpop.trf.xlu1 }
 0x388   : > { %v1039_v11 = vadd.f32 %v1526_v62, %v1023_v59 }
 0x38a   : > { %1043 = vst [vmem:[%s304_s17 + $0x18] sm:$0xff] %v1039_v11 }
 0x38b   : > { %1540 = shalt.err (!%p1537_p10)
}
 0x38c   : > { %s1541_s7 = scalar_lea.hbm %s2033_s6, 512  ;;  %s1545_s18 = scalar_lea.hbm %s2095_s5, 2048 }
 0x38d   : > { %p1542_p11 = scmp.ne.s32.totalorder %s2033_s6, %s1541_s7  ;;  %p1546_p0 = scmp.lt.u32.totalorder %s2033_s6, %s2095_s5 }
 0x38e   : > { %p1547_p1 = scmp.lt.u32.totalorder %s1545_s18, %s1541_s7  ;;  %p1549_p3 = scmp.lt.u32.totalorder %s1541_s7, %s2033_s6 }
 0x38f   : > { %p1543_p12 = pnand %p1542_p11, %p1721_p8 }
 0x390   : > { %p1548_p2 = por %p1547_p1, %p1546_p0 }
 0x391   : > { %p1544_p13 = pneg %p1543_p12 }
 0x392   : > { %p1550_p4 = por %p1549_p3, %p1548_p2 }
 0x394   : > { %p1551_p5 = pnand %p1550_p4, %p1544_p13 }
 0x396   : > { %1554 = shalt.err (!%p1551_p5)
}
 0x397   : > { %s1625_s24 = smov 128   ;;  %s1626_s10 = smov 256  }
 0x398   : > { %s1627_s14 = smov 8  }
 0x399   : > { %1352 = dma.vmem_to_hbm [thread:$0]  (%p1721_p8), %s2028_s0, 512, %s2033_s6, %s2038_s23, %s1625_s24, %s1626_s10, %s1627_s14  }
 0x39a PF: > { %p1358_p6 = scmp.ge.s32.totalorder %s1621_s27, 2  ;;  %s1074_s15 = sand.u32 1, %s1593_s20  }
 0x39b   : > { %s1075_s16 = scalar_lea.sflag [#allocation6], %s1074_s15 }
 0x39c   : > { %p1355_p7 = pnand %p1358_p6, %p1725_p9 }
 0x39e   : > { %1588 = dma.done.wait (!%p1355_p7), %s1075_s16, 512  }
 0x39f   : > { %1590 = vsyncadd (!%p1355_p7), %s1075_s16, 4294966784  ;;  %s19_s27 = sadd.s32 1, %s1621_s27   ;;  %s2099_s20 = smov %s1597_s21 }
 0x3a0   : > { %p16_p10 = scmp.ge.s32.totalorder %s19_s27, 6   ;;  %s2100_s21 = smov %s1601_s22 }
 0x3a1   : > { %s2101_s22 = smov %s1733_s13  ;;  %s2102_s23 = smov %s1613_s25 }
 0x3a2   : > { %s2103_s24 = smov %s1617_s26  ;;  %s2104_s25 = smov %s2107_s29 }
 0x3a3   : > { %s2105_s26 = smov %s2111_s30  ;;  %18 = sbr.rel (!%p16_p10) target bundleno = 7 (0x7), region = 123 }
 0x3aa   :  { %1080 = vsyncpa [#allocation6], 1 }
 0x3ab   :  { %1082 = vsyncpa [#allocation6 + $0x1], 1 }

</bundles_post_ra>
